<compile_context>
chip_gen: v7x
topology: tpu7x:2x2x1
jax: 0.10.0
libtpu: 0.0.40
codegen_flags: <defaults>
</compile_context>

<pallas_src>
import math

import jax
import jax.numpy as jnp
from jax.experimental import pallas as pl
from jax.experimental.pallas import tpu as pltpu


def _make_kernel(emit_embeddings: bool):
    """Builds the fused forward kernel; embeddings output is optional."""

    def kernel(x_ref, w0_ref, b0_ref, w1_ref, b1_ref, w2_ref, b2_ref,
               *out_and_scratch):
        if emit_embeddings:
            out_ref, emb_ref, acc_ref = out_and_scratch
        else:
            out_ref, acc_ref = out_and_scratch
            emb_ref = None

        k = pl.program_id(1)                         # reduction axis (inner)

        # ---- pretrained backbone: K-tiled Linear, f32 accumulation --------
        @pl.when(k == 0)
        def _():
            acc_ref[...] = jnp.zeros_like(acc_ref)

        acc_ref[...] += jnp.dot(x_ref[...], w0_ref[...],
                                preferred_element_type=jnp.float32)

        @pl.when(k == pl.num_programs(1) - 1)
        def _():
            # backbone epilogue: bias + ReLU -> backbone features (f32)
            h = jnp.maximum(acc_ref[...] + b0_ref[...], 0.0)

            # ---- additional_layers: Linear + ReLU -> "embeddings" ---------
            e = jnp.dot(h.astype(w1_ref.dtype), w1_ref[...],
                        preferred_element_type=jnp.float32)
            e = jnp.maximum(e + b1_ref[...], 0.0)            # (tb, E) f32
            if emit_embeddings:
                emb_ref[...] = e.astype(emb_ref.dtype)

            # ---- final_layer (E -> 1): VPU/XLU reduction, no N=1 matmul ---
            w2 = w2_ref[...].astype(jnp.float32)             # (1, E)
            y = jnp.sum(e * w2, axis=-1, keepdims=True) + b2_ref[0, 0]
            out_ref[...] = y.astype(out_ref.dtype)           # (tb, 1)

    return kernel


def _pick_k_tile(d_in, cap=512):
    """Largest K tile <= cap that divides d_in (multiple of 128 if possible)."""
    if d_in <= cap:
        return d_in
    for tk in range(cap, 127, -128):
        if d_in % tk == 0:
            return tk
    return d_in


def finetune_forward(x_nchw, params, get_embeddings_additional_layer=False):
    """Pallas implementation of FineTuneModel.forward.

    x_nchw: (B, C, H, W) float32 input (PyTorch NCHW convention).
    params: dict with w0 (D_in, F), b0 (1, F), w1 (F, E), b1 (1, E),
            w2 (E, 1), b2 (1, 1) — all float32 (cast to bf16 here).
    """
    B = x_nchw.shape[0]
    x_flat = x_nchw.reshape(B, -1)                 # == torch.flatten(x, 1)
    d_in = x_flat.shape[1]

    # bf16 weights / activations (halve HBM bytes); biases stay f32.
    w0 = params["w0"].astype(jnp.bfloat16)
    w1 = params["w1"].astype(jnp.bfloat16)
    w2_row = params["w2"].T.astype(jnp.bfloat16)   # (1, E)
    b0 = params["b0"].astype(jnp.float32)
    b1 = params["b1"].astype(jnp.float32)
    b2 = params["b2"].reshape(1, 1).astype(jnp.float32)

    feat = w0.shape[1]
    emb = w1.shape[1]
    out_dim = params["w2"].shape[1]
    assert out_dim == 1, "regression head expected"

    # Pad batch to bf16 sublane packing (16 rows per vreg).
    x_bf16 = x_flat.astype(jnp.bfloat16)
    b_pad = max(16, -(-B // 16) * 16)
    if b_pad != B:
        x_bf16 = jnp.pad(x_bf16, ((0, b_pad - B), (0, 0)))

    # Batch tile (parallel axis) + K tile (reduction axis, innermost).
    tb = min(b_pad, 256)
    nb = b_pad // tb
    tk = _pick_k_tile(d_in)
    nk = d_in // tk

    out_shapes = [jax.ShapeDtypeStruct((b_pad, out_dim), jnp.float32)]
    out_specs = [pl.BlockSpec((tb, out_dim), lambda i, k: (i, 0))]
    if get_embeddings_additional_layer:
        out_shapes.append(jax.ShapeDtypeStruct((b_pad, emb), jnp.float32))
        out_specs.append(pl.BlockSpec((tb, emb), lambda i, k: (i, 0)))

    flops = 2 * b_pad * (d_in * feat + feat * emb + emb)
    in_bytes = ((x_bf16.size + w0.size + w1.size + w2_row.size) * 2
                + (b0.size + b1.size + b2.size) * 4)
    out_bytes = sum(math.prod(s.shape) * 4 for s in out_shapes)
    cost = pl.CostEstimate(flops=flops, transcendentals=0,
                           bytes_accessed=in_bytes + out_bytes)

    grid_spec = pltpu.PrefetchScalarGridSpec(
        num_scalar_prefetch=0,
        grid=(nb, nk),                               # (batch tiles, K reduction)
        in_specs=[
            pl.BlockSpec((tb, tk), lambda i, k: (i, k)),        # x (K stream)
            pl.BlockSpec((tk, feat), lambda i, k: (k, 0)),      # w0 (K stream)
            pl.BlockSpec((1, feat), lambda i, k: (0, 0)),       # b0
            pl.BlockSpec((feat, emb), lambda i, k: (0, 0)),     # w1 (resident)
            pl.BlockSpec((1, emb), lambda i, k: (0, 0)),        # b1
            pl.BlockSpec((1, emb), lambda i, k: (0, 0)),        # w2 row
            pl.BlockSpec((1, 1), lambda i, k: (0, 0),
                         memory_space=pltpu.MemorySpace.SMEM),  # b2 scalar
        ],
        out_specs=tuple(out_specs),
        scratch_shapes=[pltpu.VMEM((tb, feat), jnp.float32)],   # f32 acc
    )

    results = pl.pallas_call(
        _make_kernel(get_embeddings_additional_layer),
        out_shape=tuple(out_shapes),
        grid_spec=grid_spec,
        compiler_params=pltpu.CompilerParams(
            dimension_semantics=("parallel", "arbitrary"),  # batch || , K reduce
            vmem_limit_bytes=32 * 1024 * 1024),             # safe on v7x (64 MiB)
        cost_estimate=cost,
    )(x_bf16, w0, b0, w1, b1, w2_row, b2)

    outputs = results[0][:B]
    if get_embeddings_additional_layer:
        return outputs, results[1][:B]
    return outputs


def _init_params(key, d_in, feat, emb, out_dim):
    k0, k1, k2 = jax.random.split(key, 3)
    return {
        "w0": jax.random.normal(k0, (d_in, feat), jnp.float32) / jnp.sqrt(d_in),
        "b0": jnp.zeros((1, feat), jnp.float32),
        "w1": jax.random.normal(k1, (feat, emb), jnp.float32) / jnp.sqrt(feat),
        "b1": jnp.zeros((1, emb), jnp.float32),
        "w2": jax.random.normal(k2, (emb, out_dim), jnp.float32) / jnp.sqrt(emb),
        "b2": jnp.zeros((1, out_dim), jnp.float32),
    }


def _reference_forward(x_nchw, params):
    # Pure-JAX reference using the same bf16-quantized weights/inputs so the
    # comparison isolates kernel correctness from expected bf16 rounding.
    q = lambda a: a.astype(jnp.bfloat16).astype(jnp.float32)
    x = q(x_nchw.reshape(x_nchw.shape[0], -1))
    h = jnp.maximum(x @ q(params["w0"]) + params["b0"], 0.0)
    e = jnp.maximum(h @ q(params["w1"]) + params["b1"], 0.0)
    y = e @ q(params["w2"]) + params["b2"]
    return y, e


if __name__ == "__main__":
    key = jax.random.PRNGKey(0)
    k_x, k_p = jax.random.split(key)

    # Small shapes consistent with the forward: batch=2, C=4, H=W=16.
    B, C, H, W = 2, 4, 16, 16
    D_IN = C * H * W            # 1024 flattened backbone input features
    FEAT = 256                  # pretrained backbone feature width
    EMB = 128                   # additional_layers embedding width
    OUT = 1                     # regression target

    x = jax.random.normal(k_x, (B, C, H, W), jnp.float32)
    params = _init_params(k_p, D_IN, FEAT, EMB, OUT)

    outputs, embeddings = finetune_forward(
        x, params, get_embeddings_additional_layer=True)
    outputs_only = finetune_forward(
        x, params, get_embeddings_additional_layer=False)
    jax.block_until_ready((outputs, embeddings, outputs_only))

    ref_out, ref_emb = _reference_forward(x, params)
    assert outputs.shape == (B, OUT)
    assert embeddings.shape == (B, EMB)
    assert outputs_only.shape == (B, OUT)
    # bf16 weights/inputs => loosened tolerances (expected quantization).
    assert jnp.allclose(outputs, ref_out, atol=2e-2, rtol=2e-2)
    assert jnp.allclose(embeddings, ref_emb, atol=2e-2, rtol=2e-2)
    assert jnp.allclose(outputs_only, ref_out, atol=2e-2, rtol=2e-2)

    print("KERNEL_OK")
</pallas_src>

<mosaic_0001>
module attributes {stable_mosaic.version = 11 : i64} {
  func.func @kernel(%arg0: i32, %arg1: i32, %arg2: memref<16x512xbf16, #tpu.memory_space<vmem>>, %arg3: memref<512x256xbf16, #tpu.memory_space<vmem>>, %arg4: memref<1x256xf32, #tpu.memory_space<vmem>>, %arg5: memref<256x128xbf16, #tpu.memory_space<vmem>>, %arg6: memref<1x128xf32, #tpu.memory_space<vmem>>, %arg7: memref<1x128xbf16, #tpu.memory_space<vmem>>, %arg8: memref<1x1xf32, #tpu.memory_space<smem>>, %arg9: memref<16x1xf32, #tpu.memory_space<vmem>>, %arg10: memref<16x128xf32, #tpu.memory_space<vmem>>, %arg11: memref<16x256xf32, #tpu.memory_space<vmem>>) attributes {dimension_semantics = [#tpu.dimension_semantics<parallel>, #tpu.dimension_semantics<arbitrary>], iteration_bounds = array<i64: 1, 2>, scalar_prefetch = 0 : i64, scratch_operands = 1 : i64, tpu.core_type = #tpu.core_type<tc>, window_params = [{transform_indices = @transform_0, window_bounds = array<i64: 16, 512>}, {transform_indices = @transform_1, window_bounds = array<i64: 512, 256>}, {pipeline_mode = #tpu.pipeline_mode<synchronous>, transform_indices = @transform_2, window_bounds = array<i64: 1, 256>}, {pipeline_mode = #tpu.pipeline_mode<synchronous>, transform_indices = @transform_3, window_bounds = array<i64: 256, 128>}, {pipeline_mode = #tpu.pipeline_mode<synchronous>, transform_indices = @transform_4, window_bounds = array<i64: 1, 128>}, {pipeline_mode = #tpu.pipeline_mode<synchronous>, transform_indices = @transform_5, window_bounds = array<i64: 1, 128>}, {transform_indices = @transform_6, window_bounds = array<i64: 1, 1>}, {transform_indices = @transform_7, window_bounds = array<i64: 16, 1>}, {transform_indices = @transform_8, window_bounds = array<i64: 16, 128>}]} {
    %c0_i32 = arith.constant 0 : i32
    %0 = arith.cmpi eq, %arg1, %c0_i32 : i32
    %1 = arith.extui %0 : i1 to i32
    %c0_i32_0 = arith.constant 0 : i32
    %2 = arith.cmpi ne, %1, %c0_i32_0 : i32
    scf.if %2 {
      %cst_9 = arith.constant 0.000000e+00 : f32
      %12 = vector.broadcast %cst_9 : f32 to vector<16x256xf32>
      %c0_10 = arith.constant 0 : index
      %c0_11 = arith.constant 0 : index
      %13 = vector.load %arg11[%c0_10, %c0_11] : memref<16x256xf32, #tpu.memory_space<vmem>>, vector<16x256xf32>
      tpu.vector_store %arg11[%c0_10, %c0_11], %12 {strides = array<i32>} : memref<16x256xf32, #tpu.memory_space<vmem>>, vector<16x256xf32>,
    } else {
    }
    %c0 = arith.constant 0 : index
    %c0_1 = arith.constant 0 : index
    %3 = vector.load %arg11[%c0, %c0_1] : memref<16x256xf32, #tpu.memory_space<vmem>>, vector<16x256xf32>
    %c0_2 = arith.constant 0 : index
    %c0_3 = arith.constant 0 : index
    %4 = vector.load %arg2[%c0_2, %c0_3] : memref<16x512xbf16, #tpu.memory_space<vmem>>, vector<16x512xbf16>
    %c0_4 = arith.constant 0 : index
    %c0_5 = arith.constant 0 : index
    %5 = vector.load %arg3[%c0_4, %c0_5] : memref<512x256xbf16, #tpu.memory_space<vmem>>, vector<512x256xbf16>
    %cst = arith.constant dense<0.000000e+00> : vector<16x256xf32>
    %6 = tpu.matmul %4, %5, %cst {dimension_numbers = #tpu.dot_dimension_numbers<[1], [0], [0], [1], [0, 0, 1, 1], [], []>} : vector<16x512xbf16>, vector<512x256xbf16>, vector<16x256xf32> -> vector<16x256xf32>
    %7 = arith.addf %3, %6 : vector<16x256xf32>
    %c0_6 = arith.constant 0 : index
    %c0_7 = arith.constant 0 : index
    %8 = vector.load %arg11[%c0_6, %c0_7] : memref<16x256xf32, #tpu.memory_space<vmem>>, vector<16x256xf32>
    tpu.vector_store %arg11[%c0_6, %c0_7], %7 {strides = array<i32>} : memref<16x256xf32, #tpu.memory_space<vmem>>, vector<16x256xf32>,
    %c1_i32 = arith.constant 1 : i32
    %9 = arith.cmpi eq, %arg1, %c1_i32 : i32
    %10 = arith.extui %9 : i1 to i32
    %c0_i32_8 = arith.constant 0 : i32
    %11 = arith.cmpi ne, %10, %c0_i32_8 : i32
    scf.if %11 {
      %c0_9 = arith.constant 0 : index
      %c0_10 = arith.constant 0 : index
      %12 = vector.load %arg11[%c0_9, %c0_10] : memref<16x256xf32, #tpu.memory_space<vmem>>, vector<16x256xf32>
      %c0_11 = arith.constant 0 : index
      %c0_12 = arith.constant 0 : index
      %13 = vector.load %arg4[%c0_11, %c0_12] : memref<1x256xf32, #tpu.memory_space<vmem>>, vector<1x256xf32>
      %14 = vector.broadcast %13 : vector<1x256xf32> to vector<16x256xf32>
      %15 = arith.addf %12, %14 : vector<16x256xf32>
      %cst_13 = arith.constant 0.000000e+00 : f32
      %16 = vector.broadcast %cst_13 : f32 to vector<16x256xf32>
      %17 = arith.maximumf %15, %16 : vector<16x256xf32>
      %18 = arith.truncf %17 : vector<16x256xf32> to vector<16x256xbf16>
      %c0_14 = arith.constant 0 : index
      %c0_15 = arith.constant 0 : index
      %19 = vector.load %arg5[%c0_14, %c0_15] : memref<256x128xbf16, #tpu.memory_space<vmem>>, vector<256x128xbf16>
      %cst_16 = arith.constant dense<0.000000e+00> : vector<16x128xf32>
      %20 = tpu.matmul %18, %19, %cst_16 {dimension_numbers = #tpu.dot_dimension_numbers<[1], [0], [0], [1], [0, 0, 1, 1], [], []>} : vector<16x256xbf16>, vector<256x128xbf16>, vector<16x128xf32> -> vector<16x128xf32>
      %c0_17 = arith.constant 0 : index
      %c0_18 = arith.constant 0 : index
      %21 = vector.load %arg6[%c0_17, %c0_18] : memref<1x128xf32, #tpu.memory_space<vmem>>, vector<1x128xf32>
      %22 = vector.broadcast %21 : vector<1x128xf32> to vector<16x128xf32>
      %23 = arith.addf %20, %22 : vector<16x128xf32>
      %cst_19 = arith.constant 0.000000e+00 : f32
      %24 = vector.broadcast %cst_19 : f32 to vector<16x128xf32>
      %25 = arith.maximumf %23, %24 : vector<16x128xf32>
      %c0_20 = arith.constant 0 : index
      %c0_21 = arith.constant 0 : index
      %26 = vector.load %arg10[%c0_20, %c0_21] : memref<16x128xf32, #tpu.memory_space<vmem>>, vector<16x128xf32>
      tpu.vector_store %arg10[%c0_20, %c0_21], %25 {strides = array<i32>} : memref<16x128xf32, #tpu.memory_space<vmem>>, vector<16x128xf32>,
      %c0_22 = arith.constant 0 : index
      %c0_23 = arith.constant 0 : index
      %27 = vector.load %arg7[%c0_22, %c0_23] : memref<1x128xbf16, #tpu.memory_space<vmem>>, vector<1x128xbf16>
      %28 = arith.extf %27 : vector<1x128xbf16> to vector<1x128xf32>
      %29 = vector.broadcast %28 : vector<1x128xf32> to vector<16x128xf32>
      %30 = arith.mulf %25, %29 : vector<16x128xf32>
      %cst_24 = arith.constant dense<0.000000e+00> : vector<16xf32>
      %31 = vector.multi_reduction <add>, %30, %cst_24 [1] : vector<16x128xf32> to vector<16xf32>
      %32 = vector.shape_cast %31 : vector<16xf32> to vector<16x1xf32>
      %c0_25 = arith.constant 0 : index
      %c0_26 = arith.constant 0 : index
      %33 = memref.load %arg8[%c0_25, %c0_26] : memref<1x1xf32, #tpu.memory_space<smem>>
      %34 = vector.broadcast %33 : f32 to vector<16x1xf32>
      %35 = arith.addf %32, %34 : vector<16x1xf32>
      %c0_27 = arith.constant 0 : index
      %c0_28 = arith.constant 0 : index
      %36 = vector.load %arg9[%c0_27, %c0_28] : memref<16x1xf32, #tpu.memory_space<vmem>>, vector<16x1xf32>
      tpu.vector_store %arg9[%c0_27, %c0_28], %35 {strides = array<i32>} : memref<16x1xf32, #tpu.memory_space<vmem>>, vector<16x1xf32>,
    } else {
    }
    return
  }
  func.func @transform_0(%arg0: i32, %arg1: i32) -> (i32, i32) {
    %c0_i32 = arith.constant 0 : i32
    return %arg0, %arg1 : i32, i32
  }
  func.func @transform_1(%arg0: i32, %arg1: i32) -> (i32, i32) {
    %c0_i32 = arith.constant 0 : i32
    %c0_i32_0 = arith.constant 0 : i32
    return %arg1, %c0_i32 : i32, i32
  }
  func.func @transform_2(%arg0: i32, %arg1: i32) -> (i32, i32) {
    %c0_i32 = arith.constant 0 : i32
    %c0_i32_0 = arith.constant 0 : i32
    %c0_i32_1 = arith.constant 0 : i32
    return %c0_i32, %c0_i32_0 : i32, i32
  }
  func.func @transform_3(%arg0: i32, %arg1: i32) -> (i32, i32) {
    %c0_i32 = arith.constant 0 : i32
    %c0_i32_0 = arith.constant 0 : i32
    %c0_i32_1 = arith.constant 0 : i32
    return %c0_i32, %c0_i32_0 : i32, i32
  }
  func.func @transform_4(%arg0: i32, %arg1: i32) -> (i32, i32) {
    %c0_i32 = arith.constant 0 : i32
    %c0_i32_0 = arith.constant 0 : i32
    %c0_i32_1 = arith.constant 0 : i32
    return %c0_i32, %c0_i32_0 : i32, i32
  }
  func.func @transform_5(%arg0: i32, %arg1: i32) -> (i32, i32) {
    %c0_i32 = arith.constant 0 : i32
    %c0_i32_0 = arith.constant 0 : i32
    %c0_i32_1 = arith.constant 0 : i32
    return %c0_i32, %c0_i32_0 : i32, i32
  }
  func.func @transform_6(%arg0: i32, %arg1: i32) -> (i32, i32) {
    %c0_i32 = arith.constant 0 : i32
    %c0_i32_0 = arith.constant 0 : i32
    %c0_i32_1 = arith.constant 0 : i32
    return %c0_i32, %c0_i32_0 : i32, i32
  }
  func.func @transform_7(%arg0: i32, %arg1: i32) -> (i32, i32) {
    %c0_i32 = arith.constant 0 : i32
    %c0_i32_0 = arith.constant 0 : i32
    return %arg0, %c0_i32 : i32, i32
  }
  func.func @transform_8(%arg0: i32, %arg1: i32) -> (i32, i32) {
    %c0_i32 = arith.constant 0 : i32
    %c0_i32_0 = arith.constant 0 : i32
    return %arg0, %c0_i32 : i32, i32
  }
}

</mosaic_0001>

<bundles_post_ra>
// kernel: tpu_custom_call.1
= control target key start
LH: loop header
LB: loop body
LE: loop exit
PB: predicated region body
PF: predicated region fallthrough
CT: control target
= control target key end

     0   :  { %s2186_s0 = inlined_call_operand.hbm [shape: bf16[16,1024], index: 0, kind: input, shape index: {}]   ;;  %s2187_s1 = inlined_call_operand.hbm [shape: bf16[1024,256], index: 1, kind: input, shape index: {}]   ;;  %s2188_s2 = inlined_call_operand.vmem [shape: f32[1,256], index: 2, kind: input, shape index: {}]   ;;  %s2189_s3 = inlined_call_operand.hbm [shape: bf16[256,128], index: 3, kind: input, shape index: {}]   ;;  %s2190_s4 = inlined_call_operand.vmem [shape: f32[1,128], index: 4, kind: input, shape index: {}]   ;;  %s2191_s5 = inlined_call_operand.vmem [shape: bf16[1,128], index: 5, kind: input, shape index: {}]   ;;  %s2192_s6 = inlined_call_operand.<no memory space> [shape: f32[1,1], index: 6, kind: input, shape index: {}]   ;;  %s2193_s7 = inlined_call_operand.vmem [shape: f32[16,1], index: 7, kind: output, shape index: {0}]   ;;  %s2194_s8 = inlined_call_operand.hbm [shape: f32[16,128], index: 8, kind: output, shape index: {1}]  }
   0x1   :  { %2201 = sst [smem:[#allocation18_spill]] %s2186_s0 }
   0x2   :  { %2202 = sst [smem:[#allocation19_spill]] %s2189_s3 }
   0x3   :  { %14 = sst [smem:[#allocation3]] %s2192_s6 }
   0x4   :  { %15 = vsyncpa [#allocation5], 0 }
   0x5   :  { %17 = vsyncpa [#allocation5 + $0x1], 0 }
   0x6   :  { %18 = vsyncpa [#allocation8], 0 }
   0x7   :  { %20 = vsyncpa [#allocation8 + $0x1], 0 }
   0x8   :  { %21 = vsyncpa [#allocation6], 0  ;;  %s1874_s29 = smov 0   ;;  %s1876_s30 = smov 0  }
   0x9   :  { %s1878_s9 = smov 0   ;;  %s1880_s10 = smov 0  }
   0xa   :  { %s1882_s11 = smov 0   ;;  %s1884_s12 = smov 0  }
   0xb LB: > { %2203 = sst [smem:[#allocation15_spill]] %s1798_s9  ;;  %s1903_s6 = sadd.s32 4294967295, %s1810_s12   ;;  %s1810_s12 = sphi %s1884_s12, %s27_s12   ;;  %s1806_s11 = sphi %s1882_s11, %s2224_s11   ;;  %s1802_s10 = sphi %s1880_s10, %s2223_s10   ;;  %s1798_s9 = sphi %s1878_s9, %s2219_s9   ;;  %s1794_s30 = sphi %s1876_s30, %s2222_s30   ;;  %s1790_s29 = sphi %s1874_s29, %s2221_s29  }
   0xc   : > { %s48_s13 = sadd.s32 1, %s1798_s9  ;;  %p55_p0 = scmp.ne.s32.totalorder %s1798_s9, %s1794_s30 }
   0xd   : > { %p56_p1 = scmp.eq.s32.totalorder %s1810_s12, 0  ;;  %p61_p2 = scmp.ne.s32.totalorder %s1794_s30, %s1790_s29 }
   0xe   : > { %p2195_p3 = scmp.eq.s32.totalorder %s1903_s6, 0  ;;  %p1292_p5 = scmp.ge.s32.totalorder %s1810_s12, 1 }
   0xf   : > { %p57_p4 = por %p56_p1, %p55_p0  ;;  %p255_p7 = scmp.lt.s32.totalorder %s1810_s12, 3 }
  0x10   : > { %p1914_p6 = por %p2195_p3, %p61_p2  ;;  %s1812_s16 = smov [#allocation9]  }
  0x11   : > { %p1919_p8 = pnand %p1292_p5, %p255_p7  ;;  %s270_s17 = sshll.u32 %s1812_s16, 4  ;;  %s271_s17 = int_to_ptr.vmem [resolvable:$true] %s270_s17 }
  0x12   : > { %s2204_s14 = scalar_select %p1914_p6, 1, 0 }
  0x13   : > { %s2205_s15 = scalar_select %p1919_p8, 1, 0 }
  0x14   : > { %p1440_p9 = pneg %p1919_p8  ;;  %p1452_p10 = scmp.lt.s32.totalorder %s1810_s12, 2 }
  0x15   : > { %s36_s20 = sadd.s32 1, %s1806_s11  ;;  %s2208_s3 = sld [smem:[#allocation19_spill]] }
  0x16   : > { %p1928_p11 = pnand %p1440_p9, %p2195_p3  ;;  %p1932_p12 = pnand %p1452_p10, %p57_p4 }
  0x18   : > { %s2207_s19 = scalar_select %p1932_p12, 1, 0 }
  0x19   : > { %p1636_p0 = pneg %p1928_p11 }
  0x1b   : > { %s1634_s23 = scalar_lea.hbm %s2208_s3, 2048 }
  0x1c   : > { %p1635_p13 = scmp.ne.s32.totalorder %s2208_s3, %s1634_s23  ;;  %p1641_p4 = scmp.lt.u32.totalorder %s1634_s23, %s2208_s3 }
  0x1e   : > { %p1637_p1 = pnand %p1636_p0, %p1635_p13 }
  0x20   : > { %p1638_p2 = pneg %p1637_p1 }
  0x22   : > { %p1643_p5 = pnand %p1641_p4, %p1638_p2 }
  0x24   : > { %1646 = shalt.err (!%p1643_p5)
}
  0x25   : > { %s1647_s28 = scalar_lea.vmem %s271_s17, 2048  ;;  %p1655_p3 = scmp.lt.s32.totalorder %s271_s17, %s271_s17 }
  0x26   : > { %p1648_p7 = scmp.ne.s32.totalorder %s271_s17, %s1647_s28  ;;  %p1656_p6 = scmp.lt.s32.totalorder %s1647_s28, %s1647_s28 }
  0x28   : > { %p1650_p9 = pnand %p1648_p7, %p1636_p0  ;;  %p1657_p8 = por %p1656_p6, %p1655_p3 }
  0x2a   : > { %p1651_p10 = pneg %p1650_p9 }
  0x2c   : > { %p1658_p12 = pnand %p1657_p8, %p1651_p10 }
  0x2e   : > { %1661 = shalt.err (!%p1658_p12)
}
  0x2f   : > { %s1813_s29 = smov 64   ;;  %s1814_s16 = smov 4  }
  0x30   : > { %1443 = dma.hbm_to_vmem [thread:$0]  (!%p1928_p11), %s2208_s3, 2048, %s271_s17, [#allocation8], %s1813_s29, %s1813_s29, %s1814_s16  }
  0x31   : > { %p37_p13 = scmp.ge.s32.totalorder %s36_s20, 2  ;;  %s1954_s23 = sand.u32 1, %s1798_s9  }
  0x32   : > { %s1399_s24 = sshll.u32 %s1806_s11, 8  ;;  %s1295_s25 = sshll.u32 %s1954_s23, 5 }
  0x33   : > { %s2226_s20 = smov (%p37_p13, %s36_s20), 0  ;;  %s2210_s0 = sld [smem:[#allocation18_spill]] }
  0x34   : > { %2209 = sst [smem:[#allocation16_spill]] %s2226_s20  ;;  %s44_s26 = ssub.s32 %s1806_s11, %s2226_s20 }
  0x35   : > { %p46_p3 = scmp.eq.s32.totalorder %s44_s26, 0  ;;  %s297_s17 = scalar_lea.vmem [#allocation4], %s1295_s25 }
  0x36   : > { %s307_s29 = sshll.u32 %s297_s17, 4  ;;  %s294_s22 = scalar_lea.sflag [#allocation5], %s1954_s23  ;;  %s1972_s29 = int_to_ptr.vmem [resolvable:$true] %s307_s29 }
  0x37   : > { %s1970_s16 = scalar_select %p46_p3, %s1798_s9, %s48_s13  }
  0x38   : > { %p2212_p8 = scmp.ne.s32.totalorder %s2207_s19, 0 }
  0x39   : > { %s1965_s28 = scalar_lea.hbm %s2210_s0, %s1399_s24  ;;  %2211 = sst [smem:[#allocation17_spill]] %s1970_s16 }
  0x3a   : > { %s1662_s3 = scalar_lea.hbm %s1965_s28, 512  ;;  %p1664_p11 = pneg %p2212_p8 }
  0x3b   : > { %p1663_p6 = scmp.ne.s32.totalorder %s1965_s28, %s1662_s3  ;;  %s1667_s25 = scalar_lea.hbm %s2210_s0, 1024 }
  0x3c   : > { %p1668_p1 = scmp.lt.u32.totalorder %s1965_s28, %s2210_s0  ;;  %p1669_p2 = scmp.lt.u32.totalorder %s1667_s25, %s1662_s3 }
  0x3d   : > { %p1665_p12 = pnand %p1664_p11, %p1663_p6  ;;  %p1671_p5 = scmp.lt.u32.totalorder %s1662_s3, %s1965_s28 }
  0x3e   : > { %p1670_p4 = por %p1669_p2, %p1668_p1 }
  0x3f   : > { %p1666_p0 = pneg %p1665_p12 }
  0x40   : > { %p1672_p7 = por %p1671_p5, %p1670_p4 }
  0x42   : > { %p1673_p9 = pnand %p1672_p7, %p1666_p0 }
  0x44   : > { %1676 = shalt.err (!%p1673_p9)
}
  0x45   : > { %s1677_s13 = scalar_lea.vmem %s1972_s29, 512  ;;  %s1815_s17 = smov [#allocation4]  }
  0x46   : > { %p1678_p10 = scmp.ne.s32.totalorder %s1972_s29, %s1677_s13  ;;  %s1682_s24 = sshll.u32 %s1815_s17, 4  ;;  %s1683_s24 = int_to_ptr.vmem [resolvable:$false] %s1682_s24 }
  0x47   : > { %s1684_s26 = scalar_lea.vmem %s1683_s24, 1024  ;;  %p1685_p6 = scmp.lt.s32.totalorder %s1972_s29, %s1683_s24 }
  0x48   : > { %p1680_p13 = pnand %p1678_p10, %p1664_p11  ;;  %p1686_p12 = scmp.lt.s32.totalorder %s1684_s26, %s1677_s13 }
  0x4a   : > { %p1681_p3 = pneg %p1680_p13  ;;  %p1687_p1 = por %p1686_p12, %p1685_p6 }
  0x4c   : > { %p1688_p2 = pnand %p1687_p1, %p1681_p3 }
  0x4e   : > { %1691 = shalt.err (!%p1688_p2)
}
  0x4f   : > { %s1816_s3 = smov 512   ;;  %s1817_s25 = smov 256  }
  0x50   : > { %s1818_s27 = smov 16   ;;  %s1298_s18 = sshll.u32 %s1954_s23, 9 }
  0x51   : > { %1447 = dma.hbm_to_vmem [thread:$0]  (!%p2212_p8), %s1965_s28, 512, %s1972_s29, %s294_s22, %s1816_s3, %s1817_s25, %s1818_s27  }
  0x52   : > { %s1401_s17 = sshll.u32 %s1806_s11, 13  ;;  %s321_s21 = scalar_lea.vmem [#allocation7], %s1298_s18 }
  0x53   : > { %s2008_s26 = scalar_lea.hbm %s2187_s1, %s1401_s17  ;;  %s329_s0 = sshll.u32 %s321_s21, 4  ;;  %s2010_s0 = int_to_ptr.vmem [resolvable:$true] %s329_s0 }
  0x54   : > { %s2213_s20 = sand.u32 1, %s1810_s12   ;;  %s1692_s9 = scalar_lea.hbm %s2008_s26, 8192 }
  0x55   : > { %s2014_s16 = scalar_lea.sflag [#allocation8], %s2213_s20  ;;  %p1693_p0 = scmp.ne.s32.totalorder %s2008_s26, %s1692_s9 }
  0x56   : > { %s1697_s29 = scalar_lea.hbm %s2187_s1, 16384  ;;  %p1698_p7 = scmp.lt.u32.totalorder %s2008_s26, %s2187_s1 }
  0x57   : > { %p1695_p4 = pnand %p1693_p0, %p1664_p11  ;;  %p1699_p9 = scmp.lt.u32.totalorder %s1697_s29, %s1692_s9 }
  0x58   : > { %p1701_p13 = scmp.lt.u32.totalorder %s1692_s9, %s2008_s26 }
  0x59   : > { %p1696_p5 = pneg %p1695_p4  ;;  %p1700_p10 = por %p1699_p9, %p1698_p7 }
  0x5b   : > { %p1702_p3 = por %p1701_p13, %p1700_p10 }
  0x5d   : > { %p1703_p6 = pnand %p1702_p3, %p1696_p5 }
  0x5f   : > { %1706 = shalt.err (!%p1703_p6)
}
  0x60   : > { %s1707_s20 = scalar_lea.vmem %s2010_s0, 8192  ;;  %s1819_s21 = smov [#allocation7]  }
  0x61   : > { %p1708_p12 = scmp.ne.s32.totalorder %s2010_s0, %s1707_s20  ;;  %s1712_s25 = sshll.u32 %s1819_s21, 4  ;;  %s1713_s25 = int_to_ptr.vmem [resolvable:$false] %s1712_s25 }
  0x62   : > { %s1714_s27 = scalar_lea.vmem %s1713_s25, 16384  ;;  %p1715_p0 = scmp.lt.s32.totalorder %s2010_s0, %s1713_s25 }
  0x63   : > { %p1710_p1 = pnand %p1708_p12, %p1664_p11  ;;  %p1716_p4 = scmp.lt.s32.totalorder %s1714_s27, %s1707_s20 }
  0x65   : > { %p1711_p2 = pneg %p1710_p1  ;;  %p1717_p7 = por %p1716_p4, %p1715_p0 }
  0x67   : > { %p1718_p9 = pnand %p1717_p7, %p1711_p2 }
  0x69   : > { %1721 = shalt.err (!%p1718_p9)
}
  0x6a   : > { %s1820_s9 = smov 128   ;;  %s1821_s18 = smov 8  }
  0x6b   : > { %1450 = dma.hbm_to_vmem [thread:$0]  (!%p2212_p8), %s2008_s26, 8192, %s2010_s0, %s2014_s16, %s1820_s9, %s1820_s9, %s1821_s18  }
  0x6c   : > { %p2214_p11 = scmp.ne.s32.totalorder %s2205_s15, 0 }
  0x6d   : > { %s343_s17 = sand.u32 (!%p2214_p11), 1, %s1794_s30   ;;  %p2215_p5 = scmp.ne.s32.totalorder (!%p2214_p11), %s2204_s14, 0 }
  0x6e   : > { %341 = sbr.rel (%p2214_p11) target bundleno = 829 (0x33d), region = 48  ;;  %s1303_s13 = sshll.u32 (!%p2214_p11), %s343_s17, 5 }
  0x6f   : > { %s344_s24 = scalar_lea.sflag (!%p2214_p11), [#allocation5], %s343_s17  ;;  %s2043_s23 = scalar_lea.vmem (!%p2214_p11), [#allocation4], %s1303_s13 }
  0x75   : > { %1773 = dma.done.wait (%p2215_p5), %s344_s24, 512  }
  0x76   : > { %1775 = vsyncadd (%p2215_p5), %s344_s24, 4294966784  ;;  %s352_s28 = sand.u32 1, %s1903_s6   ;;  %s1304_s19 = sshll.u32 %s343_s17, 9 }
  0x77   : > { %s353_s0 = scalar_lea.sflag [#allocation8], %s352_s28  ;;  %s2050_s16 = scalar_lea.vmem [#allocation7], %s1304_s19 }
  0x78   : > { %1777 = dma.done.wait (%p2215_p5), %s353_s0, 8192  }
  0x79   : > { %1779 = vsyncadd (%p2215_p5), %s353_s0, 4294959104  ;;  %p2216_p8 = scmp.eq.s32.totalorder %s1903_s6, 0 }
  0x7b   : > { %1781 = dma.done.wait (%p2216_p8), [#allocation8], 2048   ;;  %p2217_p10 = pmov %p2216_p8 }
  0x7c   : > { %p1306_p13 = scmp.ne.s32.totalorder %s1802_s10, 0 }
  0x7d   : > { %1783 = vsyncadd (%p2217_p10), [#allocation8], 4294965248  ;;  %v1822_v0 = vmov (!%p1306_p13), 0.0  }
  0x7e   : > { %412 = sbr.rel (%p1306_p13) target bundleno = 133 (0x85), region = 64  ;;  %413 = vst [vmem:[#allocation2] sm:$0xff] (!%p1306_p13), %v1822_v0  ;;  %414 = vst [vmem:[#allocation2 + $0x8] sm:$0xff] (!%p1306_p13), %v1822_v0 }
  0x7f   : > { %415 = vst [vmem:[#allocation2 + $0x10] sm:$0xff] (!%p1306_p13), %v1822_v0  ;;  %416 = vst [vmem:[#allocation2 + $0x18] sm:$0xff] (!%p1306_p13), %v1822_v0 }
  0x85 PF: > { %v1516_v1 = vld [vmem:[%s2050_s16 + $0x4] ss:$8 sps:$4 sm:$0xff]   ;;  %v1520_v3 = vld [vmem:[%s2050_s16] ss:$8 sps:$4 sm:$0xff]   ;;  %v1522_v5 = vld [vmem:[%s2050_s16 + $0x14] ss:$8 sps:$4 sm:$0xff]  }
  0x86   : > { %v1518_v2 = vld [vmem:[%s2050_s16 + $0x104] ss:$8 sps:$4 sm:$0xff]   ;;  %829 = vmatprep.subr.bf16.mxu1 %v1516_v1  ;;  %v1521_v4 = vld [vmem:[%s2050_s16 + $0x100] ss:$8 sps:$4 sm:$0xff]   ;;  %v1524_v6 = vld [vmem:[%s2050_s16 + $0x114] ss:$8 sps:$4 sm:$0xff]  }
  0x87   : > { %872 = vmatprep.subr.bf16.mxu0 %v1518_v2  ;;  %830 = vmatpush1.bf16.msra.mxu1 %v1520_v3  ;;  %v1526_v7 = vld [vmem:[%s2050_s16 + $0x10] ss:$8 sps:$4 sm:$0xff]   ;;  %v1528_v9 = vld [vmem:[%s2050_s16 + $0x24] ss:$8 sps:$4 sm:$0xff]   ;;  %v1532_v11 = vld [vmem:[%s2050_s16 + $0x20] ss:$8 sps:$4 sm:$0xff]  }
  0x88   : > { %873 = vmatpush1.bf16.msra.mxu0 %v1521_v4  ;;  %831 = vmatprep.subr.bf16.mxu1 %v1522_v5  ;;  %v1527_v8 = vld [vmem:[%s2050_s16 + $0x110] ss:$8 sps:$4 sm:$0xff]   ;;  %v1530_v10 = vld [vmem:[%s2050_s16 + $0x124] ss:$8 sps:$4 sm:$0xff]   ;;  %v1533_v12 = vld [vmem:[%s2050_s16 + $0x120] ss:$8 sps:$4 sm:$0xff]  }
  0x89   : > { %874 = vmatprep.subr.bf16.mxu0 %v1524_v6  ;;  %v1534_v13 = vld [vmem:[%s2050_s16 + $0x34] ss:$8 sps:$4 sm:$0xff]   ;;  %v1538_v15 = vld [vmem:[%s2050_s16 + $0x30] ss:$8 sps:$4 sm:$0xff]   ;;  %v1540_v17 = vld [vmem:[%s2050_s16 + $0x44] ss:$8 sps:$4 sm:$0xff]  }
  0x8a   : > { %v1536_v14 = vld [vmem:[%s2050_s16 + $0x134] ss:$8 sps:$4 sm:$0xff]   ;;  %v1539_v16 = vld [vmem:[%s2050_s16 + $0x130] ss:$8 sps:$4 sm:$0xff]   ;;  %v1542_v18 = vld [vmem:[%s2050_s16 + $0x144] ss:$8 sps:$4 sm:$0xff]  }
  0x8b   : > { %832 = vmatpush1.bf16.msra.mxu1 %v1526_v7  ;;  %v1544_v19 = vld [vmem:[%s2050_s16 + $0x40] ss:$8 sps:$4 sm:$0xff]   ;;  %v1546_v21 = vld [vmem:[%s2050_s16 + $0x54] ss:$8 sps:$4 sm:$0xff]   ;;  %v1550_v23 = vld [vmem:[%s2050_s16 + $0x50] ss:$8 sps:$4 sm:$0xff]  }
  0x8c   : > { %875 = vmatpush1.bf16.msra.mxu0 %v1527_v8  ;;  %833 = vmatprep.subr.bf16.mxu1 %v1528_v9  ;;  %v1545_v20 = vld [vmem:[%s2050_s16 + $0x140] ss:$8 sps:$4 sm:$0xff]   ;;  %v1548_v22 = vld [vmem:[%s2050_s16 + $0x154] ss:$8 sps:$4 sm:$0xff]   ;;  %v1551_v24 = vld [vmem:[%s2050_s16 + $0x150] ss:$8 sps:$4 sm:$0xff]  }
  0x8d   : > { %876 = vmatprep.subr.bf16.mxu0 %v1530_v10  ;;  %v1552_v25 = vld [vmem:[%s2050_s16 + $0x64] ss:$8 sps:$4 sm:$0xff]   ;;  %v1556_v27 = vld [vmem:[%s2050_s16 + $0x60] ss:$8 sps:$4 sm:$0xff]   ;;  %v1558_v29 = vld [vmem:[%s2050_s16 + $0x74] ss:$8 sps:$4 sm:$0xff]  }
  0x8e   : > { %v1554_v26 = vld [vmem:[%s2050_s16 + $0x164] ss:$8 sps:$4 sm:$0xff]   ;;  %v1557_v28 = vld [vmem:[%s2050_s16 + $0x160] ss:$8 sps:$4 sm:$0xff]   ;;  %v1560_v30 = vld [vmem:[%s2050_s16 + $0x174] ss:$8 sps:$4 sm:$0xff]  }
  0x8f   : > { %834 = vmatpush1.bf16.msra.mxu1 %v1532_v11  ;;  %v1562_v31 = vld [vmem:[%s2050_s16 + $0x70] ss:$8 sps:$4 sm:$0xff]   ;;  %v1564_v33 = vld [vmem:[%s2050_s16 + $0x84] ss:$8 sps:$4 sm:$0xff]   ;;  %v1568_v35 = vld [vmem:[%s2050_s16 + $0x80] ss:$8 sps:$4 sm:$0xff]  }
  0x90   : > { %877 = vmatpush1.bf16.msra.mxu0 %v1533_v12  ;;  %835 = vmatprep.subr.bf16.mxu1 %v1534_v13  ;;  %v1563_v32 = vld [vmem:[%s2050_s16 + $0x170] ss:$8 sps:$4 sm:$0xff]   ;;  %v1566_v34 = vld [vmem:[%s2050_s16 + $0x184] ss:$8 sps:$4 sm:$0xff]   ;;  %v1569_v36 = vld [vmem:[%s2050_s16 + $0x180] ss:$8 sps:$4 sm:$0xff]  }
  0x91   : > { %878 = vmatprep.subr.bf16.mxu0 %v1536_v14  ;;  %v1570_v37 = vld [vmem:[%s2050_s16 + $0x94] ss:$8 sps:$4 sm:$0xff]   ;;  %v1574_v39 = vld [vmem:[%s2050_s16 + $0x90] ss:$8 sps:$4 sm:$0xff]   ;;  %v1576_v41 = vld [vmem:[%s2050_s16 + $0xa4] ss:$8 sps:$4 sm:$0xff]  }
  0x92   : > { %v1572_v38 = vld [vmem:[%s2050_s16 + $0x194] ss:$8 sps:$4 sm:$0xff]   ;;  %v1575_v40 = vld [vmem:[%s2050_s16 + $0x190] ss:$8 sps:$4 sm:$0xff]   ;;  %v1578_v42 = vld [vmem:[%s2050_s16 + $0x1a4] ss:$8 sps:$4 sm:$0xff]  }
  0x93   : > { %836 = vmatpush1.bf16.msra.mxu1 %v1538_v15  ;;  %v1580_v43 = vld [vmem:[%s2050_s16 + $0xa0] ss:$8 sps:$4 sm:$0xff]   ;;  %v1582_v45 = vld [vmem:[%s2050_s16 + $0xb4] ss:$8 sps:$4 sm:$0xff]   ;;  %v1586_v47 = vld [vmem:[%s2050_s16 + $0xb0] ss:$8 sps:$4 sm:$0xff]  }
  0x94   : > { %879 = vmatpush1.bf16.msra.mxu0 %v1539_v16  ;;  %837 = vmatprep.subr.bf16.mxu1 %v1540_v17  ;;  %v1581_v44 = vld [vmem:[%s2050_s16 + $0x1a0] ss:$8 sps:$4 sm:$0xff]   ;;  %v1584_v46 = vld [vmem:[%s2050_s16 + $0x1b4] ss:$8 sps:$4 sm:$0xff]   ;;  %v1587_v49 = vld [vmem:[%s2050_s16 + $0x1b0] ss:$8 sps:$4 sm:$0xff]  }
  0x95   : > { %880 = vmatprep.subr.bf16.mxu0 %v1542_v18  ;;  %v1614_v48 = vld [vmem:[%s2043_s23 + $0x4] ss:$16 sps:$4 sm:$0xff]   ;;  %v1617_v52 = vld [vmem:[%s2043_s23 + $0xc] ss:$16 sps:$4 sm:$0xff]   ;;  %v1592_v53 = vld [vmem:[%s2050_s16 + $0xc0] ss:$8 sps:$4 sm:$0xff]  }
  0x96   : > { %v1588_v50 = vld [vmem:[%s2050_s16 + $0xc4] ss:$8 sps:$4 sm:$0xff]   ;;  %861 = vmatprep.mubr.bf16.mxu1 %v1614_v48  ;;  %904 = vmatprep.mubr.bf16.mxu0 %v1617_v52  ;;  %v1593_v54 = vld [vmem:[%s2050_s16 + $0x1c0] ss:$8 sps:$4 sm:$0xff]   ;;  %v1594_v55 = vld [vmem:[%s2050_s16 + $0xd4] ss:$8 sps:$4 sm:$0xff]  }
  0x97   : > { %838 = vmatpush1.bf16.msra.mxu1 %v1544_v19  ;;  %v1590_v51 = vld [vmem:[%s2050_s16 + $0x1c4] ss:$8 sps:$4 sm:$0xff]   ;;  %v1596_v56 = vld [vmem:[%s2050_s16 + $0x1d4] ss:$8 sps:$4 sm:$0xff]   ;;  %v1598_v57 = vld [vmem:[%s2050_s16 + $0xd0] ss:$8 sps:$4 sm:$0xff]  }
  0x98   : > { %881 = vmatpush1.bf16.msra.mxu0 %v1545_v20  ;;  %839 = vmatprep.subr.bf16.mxu1 %v1546_v21  ;;  %v1599_v58 = vld [vmem:[%s2050_s16 + $0x1d0] ss:$8 sps:$4 sm:$0xff]   ;;  %v1600_v59 = vld [vmem:[%s2050_s16 + $0xe4] ss:$8 sps:$4 sm:$0xff]   ;;  %v1604_v61 = vld [vmem:[%s2050_s16 + $0xe0] ss:$8 sps:$4 sm:$0xff]  }
  0x99   : > { %882 = vmatprep.subr.bf16.mxu0 %v1548_v22  ;;  %v1602_v60 = vld [vmem:[%s2050_s16 + $0x1e4] ss:$8 sps:$4 sm:$0xff]   ;;  %v1605_v62 = vld [vmem:[%s2050_s16 + $0x1e0] ss:$8 sps:$4 sm:$0xff]   ;;  %v1606_v63 = vld [vmem:[%s2050_s16 + $0xf4] ss:$8 sps:$4 sm:$0xff]  }
  0x9a   : > { %v1608_v0 = vld [vmem:[%s2050_s16 + $0x1f4] ss:$8 sps:$4 sm:$0xff]   ;;  %v1610_v1 = vld [vmem:[%s2050_s16 + $0xf0] ss:$8 sps:$4 sm:$0xff]   ;;  %v417_v6 = vld [vmem:[#allocation2] sm:$0xff]  ;;  %p1375_p3 = scmp.ne.s32.totalorder %s1802_s10, 1 }
  0x9b   : > { %840 = vmatpush1.bf16.msra.mxu1 %v1550_v23  ;;  %v1611_v2 = vld [vmem:[%s2050_s16 + $0x1f0] ss:$8 sps:$4 sm:$0xff]   ;;  %v418_v10 = vld [vmem:[#allocation2 + $0x8] sm:$0xff]  ;;  %s1145_s3 = sld [smem:[#allocation3]] (!%p1375_p3)  ;;  %vm1149_vm0 = vcmask (!%p1375_p3), 7168  }
  0x9c   : > { %883 = vmatpush1.bf16.msra.mxu0 %v1551_v24  ;;  %841 = vmatprep.subr.bf16.mxu1 %v1552_v25  ;;  %v1612_v3 = vld [vmem:[%s2043_s23] ss:$16 sps:$4 sm:$0xff]   ;;  %v1615_v4 = vld [vmem:[%s2043_s23 + $0x8] ss:$16 sps:$4 sm:$0xff]  }
  0x9d   : > { %884 = vmatprep.subr.bf16.mxu0 %v1554_v26  ;;  %v419_v14 = vld [vmem:[#allocation2 + $0x10] sm:$0xff]  ;;  %v420_v19 = vld [vmem:[#allocation2 + $0x18] sm:$0xff]  ;;  %v1618_v25 = vld [vmem:[#allocation9 + $0x40] sm:$0xff] (!%p1375_p3)  }
  0x9e   : > { %v1619_v26 = vld [vmem:[#allocation9] sm:$0xff] (!%p1375_p3)  }
  0x9f   : > { %842 = vmatpush1.bf16.msra.mxu1 %v1556_v27  ;;  %v1620_v27 = vld [vmem:[#allocation9 + $0x48] sm:$0xff] (!%p1375_p3)  }
  0xa0   : > { %885 = vmatpush1.bf16.msra.mxu0 %v1557_v28  ;;  %843 = vmatprep.subr.bf16.mxu1 %v1558_v29  ;;  %v1621_v28 = vld [vmem:[#allocation9 + $0x8] sm:$0xff] (!%p1375_p3)   ;;  %v1622_v29 = vld [vmem:[#allocation9 + $0x50] sm:$0xff] (!%p1375_p3)  }
  0xa1   : > { %886 = vmatprep.subr.bf16.mxu0 %v1560_v30  ;;  %v933_v30 = vlaneseq (!%p1375_p3) }
  0xa3   : > { %844 = vmatpush1.bf16.msra.mxu1 %v1562_v31  ;;  %v1623_v31 = vld [vmem:[#allocation9 + $0x10] sm:$0xff] (!%p1375_p3)  }
  0xa4   : > { %887 = vmatpush1.bf16.msra.mxu0 %v1563_v32  ;;  %845 = vmatprep.subr.bf16.mxu1 %v1564_v33  ;;  %v1624_v32 = vld [vmem:[#allocation9 + $0x58] sm:$0xff] (!%p1375_p3)   ;;  %v934_v33 = vshrl.u32 (!%p1375_p3), %v933_v30, 7 }
  0xa5   : > { %888 = vmatprep.subr.bf16.mxu0 %v1566_v34  ;;  %v1625_v34 = vld [vmem:[#allocation9 + $0x18] sm:$0xff] (!%p1375_p3)  }
  0xa7   : > { %846 = vmatpush1.bf16.msra.mxu1 %v1568_v35  ;;  %v1626_v35 = vld [vmem:[#allocation9 + $0x60] sm:$0xff] (!%p1375_p3)  }
  0xa8   : > { %889 = vmatpush1.bf16.msra.mxu0 %v1569_v36  ;;  %847 = vmatprep.subr.bf16.mxu1 %v1570_v37  ;;  %v939_v36 = vsub.s32 (!%p1375_p3), 1, %v934_v33  ;;  %v1627_v37 = vld [vmem:[#allocation9 + $0x20] sm:$0xff] (!%p1375_p3)  }
  0xa9   : > { %890 = vmatprep.subr.bf16.mxu0 %v1572_v38  ;;  %v935_v38 = vsub.s32 (!%p1375_p3), 0, %v934_v33 }
  0xab   : > { %848 = vmatpush1.bf16.msra.mxu1 %v1574_v39  ;;  %v1628_v39 = vld [vmem:[#allocation9 + $0x68] sm:$0xff] (!%p1375_p3)  }
  0xac   : > { %891 = vmatpush1.bf16.msra.mxu0 %v1575_v40  ;;  %849 = vmatprep.subr.bf16.mxu1 %v1576_v41 }
  0xad   : > { %892 = vmatprep.subr.bf16.mxu0 %v1578_v42  ;;  %v931_v42 = vld [vmem:[%s2188_s2] sm:$0x3] (!%p1375_p3) }
  0xaf   : > { %850 = vmatpush1.bf16.msra.mxu1 %v1580_v43  ;;  %v940_v43 = vrot.slane (!%p1375_p3), %v931_v42, %v939_v36 }
  0xb0   : > { %893 = vmatpush1.bf16.msra.mxu0 %v1581_v44  ;;  %851 = vmatprep.subr.bf16.mxu1 %v1582_v45  ;;  %v936_v44 = vrot.slane (!%p1375_p3), %v931_v42, %v935_v38  ;;  %v1629_v45 = vld [vmem:[#allocation9 + $0x28] sm:$0xff] (!%p1375_p3)  }
  0xb1   : > { %894 = vmatprep.subr.bf16.mxu0 %v1584_v46 }
  0xb3   : > { %852 = vmatpush1.bf16.msra.mxu1 %v1586_v47 }
  0xb4   : > { %895 = vmatpush1.bf16.msra.mxu0 %v1587_v49  ;;  %853 = vmatprep.subr.bf16.mxu1 %v1588_v50  ;;  %v1630_v50 = vld [vmem:[#allocation9 + $0x70] sm:$0xff] (!%p1375_p3)  }
  0xb5   : > { %896 = vmatprep.subr.bf16.mxu0 %v1590_v51 }
  0xb7   : > { %854 = vmatpush1.bf16.msra.mxu1 %v1592_v53 }
  0xb8   : > { %897 = vmatpush1.bf16.msra.mxu0 %v1593_v54  ;;  %855 = vmatprep.subr.bf16.mxu1 %v1594_v55  ;;  %v1631_v55 = vld [vmem:[#allocation9 + $0x30] sm:$0xff] (!%p1375_p3)  }
  0xb9   : > { %898 = vmatprep.subr.bf16.mxu0 %v1596_v56 }
  0xbb   : > { %856 = vmatpush1.bf16.msra.mxu1 %v1598_v57  ;;  %v1632_v57 = vld [vmem:[#allocation9 + $0x78] sm:$0xff] (!%p1375_p3)  }
  0xbc   : > { %899 = vmatpush1.bf16.msra.mxu0 %v1599_v58  ;;  %857 = vmatprep.subr.bf16.mxu1 %v1600_v59 }
  0xbd   : > { %900 = vmatprep.subr.bf16.mxu0 %v1602_v60  ;;  %v1633_v60 = vld [vmem:[#allocation9 + $0x38] sm:$0xff] (!%p1375_p3)  }
  0xbf   : > { %858 = vmatpush1.bf16.msra.mxu1 %v1604_v61 }
  0xc0   : > { %901 = vmatpush1.bf16.msra.mxu0 %v1605_v62  ;;  %859 = vmatprep.subr.bf16.mxu1 %v1606_v63  ;;  %v1133_v62 = vld [vmem:[%s2191_s5] sm:$0x1] (!%p1375_p3) }
  0xc1   : > { %902 = vmatprep.subr.bf16.mxu0 %v1608_v0  ;;  %v1134_v0 = vunpack.c.l.bf16 (!%p1375_p3), %v1133_v62 }
  0xc3   : > { %860 = vmatpush1.bf16.msra.mxu1 %v1610_v1 }
  0xc4   : > { %903 = vmatpush1.bf16.msra.mxu0 %v1611_v2  ;;  %v1376_v2 = vld [vmem:[%s2190_s4] ss:$0 sm:$0xff] (!%p1375_p3) }
  0xc5   : > { %1402 = vmatprep.subr.bf16.mxu0 (!%p1375_p3), %v1618_v25 }
  0xc6   : > { %862 = vmatmul.mubr.bf16.vlgmr.msra.gmra.mrb[0].mxu1 %v1612_v3 }
  0xc7   : > { %905 = vmatmul.mubr.bf16.vlgmr.msra.gmra.mrb[0].mxu0 %v1615_v4 }
  0xc8   : > { %1403 = vmatpush3.bf16.msra.mxu0 (!%p1375_p3), %v1619_v26 }
  0xc9   : > { %1404 = vmatprep.subr.bf16.mxu0 (!%p1375_p3), %v1620_v27 }
  0xcc   : > { %1405 = vmatpush3.bf16.msra.mxu0 (!%p1375_p3), %v1621_v28 }
  0xcd   : > { %1406 = vmatprep.subr.bf16.mxu0 (!%p1375_p3), %v1622_v29 }
  0xd0   : > { %1407 = vmatpush3.bf16.msra.mxu0 (!%p1375_p3), %v1623_v31 }
  0xd1   : > { %1408 = vmatprep.subr.bf16.mxu0 (!%p1375_p3), %v1624_v32 }
  0xd4   : > { %1409 = vmatpush3.bf16.msra.mxu0 (!%p1375_p3), %v1625_v34 }
  0xd5   : > { %1410 = vmatprep.subr.bf16.mxu0 (!%p1375_p3), %v1626_v35 }
  0xd8   : > { %1411 = vmatpush3.bf16.msra.mxu0 (!%p1375_p3), %v1627_v37 }
  0xd9   : > { %1412 = vmatprep.subr.bf16.mxu0 (!%p1375_p3), %v1628_v39 }
  0xdc   : > { %1413 = vmatpush3.bf16.msra.mxu0 (!%p1375_p3), %v1629_v45 }
  0xdd   : > { %1414 = vmatprep.subr.bf16.mxu0 (!%p1375_p3), %v1630_v50 }
  0xe0   : > { %1415 = vmatpush3.bf16.msra.mxu0 (!%p1375_p3), %v1631_v55 }
  0xe1   : > { %1416 = vmatprep.subr.bf16.mxu0 (!%p1375_p3), %v1632_v57 }
  0xe4   : > { %1417 = vmatpush3.bf16.msra.mxu0 (!%p1375_p3), %v1633_v60 }
 0x199   : > { %v863_v5 = vpop.f32.mrb[0].mxu1 }
 0x19a   : > { %v906_v7 = vpop.f32.mrb[0].mxu0  ;;  %v865_v9 = vpop.f32.mrb[1].mxu1 }
 0x19b   : > { %v907_v8 = vadd.f32 %v906_v7, %v863_v5  ;;  %v908_v11 = vpop.f32.mrb[1].mxu0  ;;  %v867_v13 = vpop.f32.mrb[2].mxu1 }
 0x19c   : > { %v909_v12 = vadd.f32 %v908_v11, %v865_v9  ;;  %v910_v15 = vpop.f32.mrb[2].mxu0  ;;  %v869_v18 = vpop.f32.mrb[3].mxu1  ;;  %926 = sbr.rel (%p1375_p3) target bundleno = 803 (0x323), region = 68 }
 0x19d   : > { %v915_v16 = vadd.f32 %v907_v8, %v417_v6  ;;  %v911_v17 = vadd.f32 %v910_v15, %v867_v13  ;;  %v912_v20 = vpop.f32.mrb[3].mxu0  ;;  %v1138_v8 = vrot.slane (!%p1375_p3), %v1134_v0, %v935_v38 }
 0x19e   : > { %v916_v21 = vadd.f32 %v909_v12, %v418_v10  ;;  %v913_v22 = vadd.f32 %v912_v20, %v869_v18 }
 0x19f   : > { %919 = vst [vmem:[#allocation2] sm:$0xff] %v915_v16  ;;  %v917_v23 = vadd.f32 %v911_v17, %v419_v14  ;;  %v1146_v14 = vstv (!%p1375_p3), %s1145_s3 }
 0x1a0   : > { %920 = vst [vmem:[#allocation2 + $0x8] sm:$0xff] %v916_v21  ;;  %v918_v24 = vadd.f32 %v913_v22, %v420_v19 }
 0x1a1   : > { %921 = vst [vmem:[#allocation2 + $0x10] sm:$0xff] %v917_v23 }
 0x1a2   : > { %922 = vst [vmem:[#allocation2 + $0x18] sm:$0xff] %v918_v24 }
 0x1a6   : > { %v927_v48 = vld [vmem:[#allocation2] sm:$0xff] }
 0x1a7   : > { %v928_v40 = vld [vmem:[#allocation2 + $0x8] sm:$0xff]  ;;  %v943_v53 = vadd.f32 %v936_v44, %v927_v48 }
 0x1a8   : > { %v944_v46 = vadd.f32 %v940_v43, %v928_v40  ;;  %v929_v49 = vld [vmem:[#allocation2 + $0x10] sm:$0xff] }
 0x1a9   : > { %v930_v41 = vld [vmem:[#allocation2 + $0x18] sm:$0xff]  ;;  %v945_v54 = vadd.f32 %v936_v44, %v929_v49  ;;  %v947_v58 = vmax.f32 %v943_v53, 0.0 }
 0x1aa   : > { %v946_v47 = vadd.f32 %v940_v43, %v930_v41  ;;  %v948_v51 = vmax.f32 %v944_v46, 0.0 }
 0x1ab   : > { %v949_v59 = vmax.f32 %v945_v54, 0.0 }
 0x1ac   : > { %v950_v52 = vmax.f32 %v946_v47, 0.0 }
 0x1ad   : > { %v951_v61 = vpack.c.bf16 %v949_v59, %v947_v58 }
 0x1ae   : > { %v952_v56 = vpack.c.bf16 %v950_v52, %v948_v51 }
 0x1b0   : > { %1120 = vmatprep.mubr.bf16.mxu0 %v952_v56 }
 0x1b1   : > { %1121 = vmatmul.mubr.bf16.vlgmr.msra.gmra.mrb[0].mxu0 %v951_v61 }
 0x284   : > { %v1418_v63 = vpop.f32.mrb[0].mxu0 }
 0x285   : > { %v1419_v1 = vpop.f32.mrb[1].mxu0 }
 0x286   : > { %v1420_v3 = vadd.f32 %v1419_v1, %v1418_v63  ;;  %v1421_v4 = vpop.f32.mrb[2].mxu0 }
 0x287   : > { %v1422_v5 = vpop.f32.mrb[3].mxu0 }
 0x288   : > { %v1423_v6 = vadd.f32 %v1422_v5, %v1421_v4  ;;  %v1123_v7 = vadd.f32 %v1420_v3, %v1376_v2 }
 0x28a   : > { %v1126_v9 = vadd.f32 %v1423_v6, %v1376_v2  ;;  %v1129_v10 = vmax.f32 %v1123_v7, 0.0 }
 0x28c   : > { %v1130_v11 = vmax.f32 %v1126_v9, 0.0  ;;  %v1139_v12 = vmul.f32 %v1138_v8, %v1129_v10  ;;  %1131 = vst [vmem:[#allocation10] sm:$0xff] %v1129_v10 }
 0x28e   : > { %1132 = vst [vmem:[#allocation10 + $0x8] sm:$0xff] %v1130_v11  ;;  %1141 = vadd.xlane.f32.xlu0 %v1139_v12  ;;  %v1140_v13 = vmul.f32 %v1138_v8, %v1130_v11 }
 0x292   : > { %1143 = vadd.xlane.f32.xlu0 %v1140_v13 }
 0x31b   : > { %v1142_v15 = vpop.xlane.xlu0 %1141 }
 0x31c   : > { %v1147_v16 = vadd.f32 %v1146_v14, %v1142_v15 }
 0x31e   : > { %1150 = vst.msk [vmem:[%s2193_s7] sm:$0xff] %vm1149_vm0, %v1147_v16 }
 0x31f   : > { %v1144_v17 = vpop.xlane.xlu0 %1143 }
 0x320   : > { %v1148_v18 = vadd.f32 %v1146_v14, %v1144_v17 }
 0x322   : > { %1151 = vst.msk [vmem:[%s2193_s7 + $0x8] sm:$0xff] %vm1149_vm0, %v1148_v18 }
 0x323 PF: > { %p1454_p6 = scmp.eq.s32.totalorder %s1903_s6, 1  ;;  %s1823_s9 = smov [#allocation10]  }
 0x324   : > { %s1170_s18 = sshll.u32 %s1823_s9, 4  ;;  %s1171_s18 = int_to_ptr.vmem [resolvable:$true] %s1170_s18 }
 0x325   : > { %s1722_s17 = scalar_lea.vmem %s1171_s18, 256  ;;  %p1729_p0 = scmp.lt.s32.totalorder %s1171_s18, %s1171_s18 }
 0x326   : > { %p1723_p12 = scmp.ne.s32.totalorder %s1171_s18, %s1722_s17  ;;  %p1730_p4 = scmp.lt.s32.totalorder %s1722_s17, %s1722_s17 }
 0x328   : > { %p1724_p1 = pnand %p1723_p12, %p1454_p6  ;;  %p1731_p7 = por %p1730_p4, %p1729_p0 }
 0x32a   : > { %p1725_p2 = pneg %p1724_p1 }
 0x32c   : > { %p1732_p9 = pnand %p1731_p7, %p1725_p2 }
 0x32e   : > { %1735 = shalt.err (!%p1732_p9)
}
 0x32f   : > { %s1736_s23 = scalar_lea.hbm %s2194_s8, 256 }
 0x330   : > { %p1737_p11 = scmp.ne.s32.totalorder %s2194_s8, %s1736_s23  ;;  %p1742_p10 = scmp.lt.u32.totalorder %s1736_s23, %s2194_s8 }
 0x332   : > { %p1738_p5 = pnand %p1737_p11, %p1454_p6 }
 0x334   : > { %p1739_p8 = pneg %p1738_p5 }
 0x336   : > { %p1744_p13 = pnand %p1742_p10, %p1739_p8 }
 0x338   : > { %1747 = shalt.err (!%p1744_p13)
}
 0x339   : > { %s1824_s10 = smov 128   ;;  %s1825_s14 = smov 8  }
 0x33a   : > { %1437 = dma.vmem_to_hbm [thread:$0]  (%p1454_p6), %s1171_s18, 256, %s2194_s8, [#allocation6], %s1824_s10, %s1824_s10, %s1825_s14  }
 0x33b   : > { %1785 = dma.done.wait (%p1454_p6), [#allocation6], 256  }
 0x33c   : > { %1787 = vsyncadd (%p1454_p6), [#allocation6], 4294967040 }
 0x33d PF: > { %s27_s12 = sadd.s32 1, %s1810_s12   ;;  %s2218_s22 = sld [smem:[#allocation15_spill]] }
 0x33e   : > { %p24_p3 = scmp.ge.s32.totalorder %s27_s12, 4   ;;  %s2219_s9 = sld [smem:[#allocation17_spill]] }
 0x33f   : > { %s2220_s3 = sld [smem:[#allocation16_spill]]  ;;  %s2221_s29 = smov %s1794_s30 }
 0x340   : > { %s2223_s10 = smov %s1806_s11  ;;  %26 = sbr.rel (!%p24_p3) target bundleno = 11 (0xb), region = 123 }
 0x343   : > { %s2222_s30 = smov %s2218_s22 }
 0x345   : > { %s2224_s11 = smov %s2220_s3 }
 0x347   :  { %1194 = vsyncpa [#allocation5], 1 }
 0x348   :  { %1196 = vsyncpa [#allocation5 + $0x1], 1 }
 0x349   :  { %1197 = vsyncpa [#allocation8], 1 }
 0x34a   :  { %1199 = vsyncpa [#allocation8 + $0x1], 1 }
 0x34b   :  { %1200 = vsyncpa [#allocation6], 1 }
 0x34c   :  { %1202 = vsyncpa [#allocation6 + $0x1], 1 }

</bundles_post_ra>
